<compile_context>
chip_gen: v6e
topology: v6e:2x2x1
jax: 0.10.0
libtpu: 0.0.40
codegen_flags: <defaults>
</compile_context>

<pallas_src>
import functools
import math

import jax
import jax.numpy as jnp
from jax import lax
from jax.experimental import pallas as pl
from jax.experimental.pallas import tpu as pltpu


def _vmem_params():
    """Returns (vmem_limit_bytes, per-grid-step tile budget), generation-aware.

    v5e/v6e have 128 MiB physical VMEM -> use large tiles; v7x has 64 MiB -> stay
    conservative.  Falls back to the v7x-safe numbers if the query is unavailable.
    """
    cap = 64 << 20
    try:
        cap = int(getattr(pltpu.get_tpu_info(), "vmem_capacity_bytes", cap))
    except Exception:
        pass
    if cap > (64 << 20):          # v5e / v6e (128 MiB)
        return 96 << 20, 56 << 20
    return 32 << 20, 20 << 20     # v7x-like (64 MiB)


# ---------------------------------------------------------------------------
# Kernels
# ---------------------------------------------------------------------------
def _pointwise_kernel(x_ref, w_ref, b_ref, o_ref):
    """1x1 conv as (Cout,Cin) @ (Cin,HW); BN scale pre-folded into w, only add bias.

    x_ref: (1, Cin, t_hw), w_ref: (tCo, Cin), b_ref: (tCo, 1), o_ref: (1, tCo, t_hw).
    Output lane axis is t_hw (>=128) -> lane-dense stores even for small Cout.
    """
    y = jnp.dot(w_ref[...], x_ref[0], preferred_element_type=jnp.float32)
    o_ref[0] = (y + b_ref[...]).astype(o_ref.dtype)


def _spatial_kernel(x_ref, halo_ref, w_ref, b_ref, o_ref, acc_ref, *,
                    ksize, stride, tho, wo, depthwise):
    """KxK conv + folded BN on one (batch, output-row-tile) block.

    x_ref:    (1, tho*stride, Wp, Cin)  main input rows for this tile
    halo_ref: (1, K-stride,   Wp, Cin)  bottom halo rows (same HBM array, 2nd BlockSpec)
    w_ref:    (K, K, Cin, Cout) for groups=1, (K, K, C) for depthwise (BN scale folded)
    acc_ref:  (tho, wo, Cout) f32 VMEM accumulator
    Taps are read directly from x_ref/halo_ref -- no VMEM->VMEM slab assembly copy.
    """
    body_rows = x_ref.shape[1]
    cout = o_ref.shape[-1]
    w = w_ref[...]

    def _sl(start, count):
        # TODO(synk): stride>1 uses stepped slices (untested here; demo uses stride=1).
        stop = start + (count - 1) * stride + 1
        return slice(start, stop, stride if stride > 1 else None)

    first = True

    def _accum(contrib):
        nonlocal first
        if first:
            acc_ref[...] = contrib
            first = False
        else:
            acc_ref[...] += contrib

    for kh in range(ksize):
        # Rows needed for this tap: kh + j*stride, j = 0..tho-1.  Most come from the
        # body block; the last few come from the halo block.  Leading-dim concat is
        # cheap (no cross-lane movement).
        n_body = 0
        if kh < body_rows:
            n_body = min(tho, (body_rows - 1 - kh) // stride + 1)
        parts = []
        if n_body > 0:
            parts.append(x_ref[0, _sl(kh, n_body)])
        n_halo = tho - n_body
        if n_halo > 0:
            h0 = kh + n_body * stride - body_rows
            parts.append(halo_ref[0, _sl(h0, n_halo)])
        rows = parts[0] if len(parts) == 1 else jnp.concatenate(parts, axis=0)
        # rows: (tho, Wp, Cin)

        if depthwise:
            for kw in range(ksize):
                patch = rows[:, _sl(kw, wo), :].astype(jnp.float32)
                _accum(patch * w[kh, kw].astype(jnp.float32))
        else:
            cin = rows.shape[-1]
            if ksize * cin <= 256:
                # Fold the kw taps into the MXU contraction dim: one matmul of
                # K-dim = K*Cin per kh instead of K matmuls of K-dim = Cin.
                patch = jnp.concatenate(
                    [rows[:, _sl(kw, wo), :] for kw in range(ksize)], axis=-1)
                _accum(jnp.dot(patch.reshape(tho * wo, ksize * cin),
                               w[kh].reshape(ksize * cin, cout),
                               preferred_element_type=jnp.float32
                               ).reshape(tho, wo, cout))
            else:
                for kw in range(ksize):
                    _accum(jnp.dot(rows[:, _sl(kw, wo), :].reshape(tho * wo, cin),
                                   w[kh, kw],
                                   preferred_element_type=jnp.float32
                                   ).reshape(tho, wo, cout))

    o_ref[0] = (acc_ref[...] + b_ref[...]).astype(o_ref.dtype)


# ---------------------------------------------------------------------------
# pallas_call wrappers
# ---------------------------------------------------------------------------
def pointwise_conv_bn(x3, w, bias, *, out_dtype):
    """x3: (N, Cin, HW) (NCHW-native); w: (Cout, Cin) BN-folded; bias: (Cout,)."""
    n, cin, hw = x3.shape
    cout = w.shape[0]
    limit, budget = _vmem_params()
    in_item = x3.dtype.itemsize
    out_item = jnp.dtype(out_dtype).itemsize

    # Cout tiling so big layers never need the whole weight VMEM-resident.
    tco = cout if cout <= 512 else 256
    # TODO(synk): Cin-reduction tiling (grid K axis + f32 accumulator) for very large Cin.

    if hw % 128 != 0:
        thw = hw                                   # full-extent lane block
    else:
        fixed = 2 * (tco * cin * in_item + tco * 4)
        thw, t = 128, 128
        while t <= min(hw, 16384):
            if 2 * t * (cin * in_item + tco * out_item) + fixed <= budget:
                thw = t
                t *= 2
            else:
                break

    grid = (n, pl.cdiv(hw, thw), pl.cdiv(cout, tco))

    cost = pl.CostEstimate(
        flops=2 * n * hw * cin * cout,
        transcendentals=0,
        bytes_accessed=(x3.size * in_item + w.size * w.dtype.itemsize
                        + n * hw * cout * out_item + cout * 4))

    return pl.pallas_call(
        _pointwise_kernel,
        out_shape=jax.ShapeDtypeStruct((n, cout, hw), out_dtype),
        grid=grid,
        in_specs=[
            pl.BlockSpec((1, cin, thw), lambda b, i, j: (b, 0, i)),
            pl.BlockSpec((tco, cin), lambda b, i, j: (j, 0)),
            pl.BlockSpec((tco, 1), lambda b, i, j: (j, 0)),
        ],
        out_specs=pl.BlockSpec((1, tco, thw), lambda b, i, j: (b, j, i)),
        compiler_params=pltpu.CompilerParams(
            dimension_semantics=("parallel", "parallel", "parallel"),
            vmem_limit_bytes=limit),
        cost_estimate=cost,
    )(x3, w, bias.reshape(cout, 1).astype(jnp.float32))


def spatial_conv_bn(x_nhwc, w, bias, *, ksize, stride, padding, depthwise, out_dtype):
    """KxK conv + (folded) BN.  x_nhwc: (N,H,W,Cin); w: (K,K,Cin,Cout) or (K,K,C)."""
    n, h, wdim, cin = x_nhwc.shape
    cout = w.shape[-1]
    ho = (h + 2 * padding - ksize) // stride + 1
    wo = (wdim + 2 * padding - ksize) // stride + 1
    assert ho >= 1 and wo >= 1
    halo = ksize - stride
    # TODO(synk): kernel_size == stride (patchify-style) needs a halo-free path.
    assert halo >= 1, "spatial path requires kernel_size > stride"

    limit, budget = _vmem_params()
    in_item = x_nhwc.dtype.itemsize
    out_item = jnp.dtype(out_dtype).itemsize
    wp = wdim + 2 * padding

    # Output-row tile: multiple of g so the halo block's element offset (r+1)*tho*stride
    # is a multiple of the halo block height; sized against the VMEM budget.
    g = halo // math.gcd(halo, stride)

    def step_bytes(t):
        body = t * stride * wp * cin * in_item
        halo_b = halo * wp * cin * in_item
        out_b = t * wo * cout * out_item
        acc_b = t * wo * cout * 4
        w_b = w.size * w.dtype.itemsize + cout * 4
        return 2 * (body + halo_b + out_b + w_b) + acc_b

    # ho < g is the only case where the (single) tile exceeds ho (masked writeback).
    tho = (ho // g) * g if ho >= g else g
    while tho > g and step_bytes(tho) > budget:
        tho = max(g, (tho // 2 // g) * g)

    nr = pl.cdiv(ho, tho)
    body_rows = tho * stride
    halo_stride = body_rows // halo        # block-index multiplier for the halo spec

    # Spatial zero padding; bottom padded so every tile's (body + halo) read is in
    # bounds, including the partial last tile.
    # TODO(synk): fold the zero padding (and the NCHW<->NHWC transposes in __call__)
    # into the kernel / adjacent layers to avoid extra HBM passes on mem-bound layers.
    hp_needed = nr * body_rows + halo
    pad_bottom = max(padding, hp_needed - (h + padding))
    xp = jnp.pad(x_nhwc, ((0, 0), (padding, pad_bottom), (padding, padding), (0, 0)))

    zero_w_idx = (0,) * w.ndim
    kernel = functools.partial(_spatial_kernel, ksize=ksize, stride=stride,
                               tho=tho, wo=wo, depthwise=depthwise)

    cost = pl.CostEstimate(
        flops=2 * n * ho * wo * ksize * ksize * (1 if depthwise else cin) * cout,
        transcendentals=0,
        bytes_accessed=(xp.size * xp.dtype.itemsize + w.size * w.dtype.itemsize
                        + n * ho * wo * cout * out_item + cout * 4))

    return pl.pallas_call(
        kernel,
        out_shape=jax.ShapeDtypeStruct((n, ho, wo, cout), out_dtype),
        grid=(n, nr),
        in_specs=[
            # main rows of the tile
            pl.BlockSpec((1, body_rows, wp, cin), lambda b, r: (b, r, 0, 0)),
            # bottom halo rows (same array; overlapping read via a second spec)
            pl.BlockSpec((1, halo, wp, cin),
                         lambda b, r: (b, (r + 1) * halo_stride, 0, 0)),
            pl.BlockSpec(w.shape, lambda b, r: zero_w_idx),
            pl.BlockSpec((1, cout), lambda b, r: (0, 0)),
        ],
        out_specs=pl.BlockSpec((1, tho, wo, cout), lambda b, r: (b, r, 0, 0)),
        scratch_shapes=[pltpu.VMEM((tho, wo, cout), jnp.float32)],
        compiler_params=pltpu.CompilerParams(
            dimension_semantics=("parallel", "parallel"),
            vmem_limit_bytes=limit),
        cost_estimate=cost,
    )(xp, xp, w, bias.reshape(1, cout).astype(jnp.float32))


# ---------------------------------------------------------------------------
# ConvBn module (Conv2d bias=False + BatchNorm2d, eval mode)
# ---------------------------------------------------------------------------
class ConvBn:
    def __init__(self, in_channels, out_channels, kernel_size=1, stride=1,
                 padding=0, groups=1, *, key, eps=1e-5):
        self.in_channels = in_channels
        self.out_channels = out_channels
        self.kernel_size = kernel_size
        self.stride = stride
        self.padding = padding
        self.groups = groups
        self.eps = eps

        kconv, kbn = jax.random.split(key)
        fan_in = (in_channels // groups) * kernel_size * kernel_size
        bound = 1.0 / math.sqrt(fan_in)
        # PyTorch Conv2d weight layout: (out_channels, in_channels // groups, K, K)
        self.weight = jax.random.uniform(
            kconv, (out_channels, in_channels // groups, kernel_size, kernel_size),
            jnp.float32, minval=-bound, maxval=bound)
        k1, k2, k3, k4 = jax.random.split(kbn, 4)
        self.gamma = 1.0 + 0.1 * jax.random.normal(k1, (out_channels,), jnp.float32)
        self.beta = 0.1 * jax.random.normal(k2, (out_channels,), jnp.float32)
        self.running_mean = 0.1 * jax.random.normal(k3, (out_channels,), jnp.float32)
        self.running_var = jax.random.uniform(k4, (out_channels,), jnp.float32,
                                              minval=0.5, maxval=1.5)

    def _folded(self):
        scale = self.gamma / jnp.sqrt(self.running_var + self.eps)
        bias = self.beta - self.running_mean * scale
        return scale, bias

    def __call__(self, x_nchw, *, compute_dtype=None):
        """compute_dtype=jnp.bfloat16 halves operand HBM bytes and is recommended on
        v5e, v6e and v7x alike (the MXU consumes bf16 natively on all three);
        accumulation stays f32 and the output keeps x's dtype."""
        n, cin, h, wdim = x_nchw.shape
        assert cin == self.in_channels
        out_dtype = x_nchw.dtype
        scale, bias = self._folded()
        k, s, p, g = self.kernel_size, self.stride, self.padding, self.groups

        if g == 1 and k == 1:
            # NCHW-native 1x1 path: no transposes, H*W on the lane axis.
            assert p == 0, "TODO(synk): padding>0 with kernel_size=1 not implemented"
            x = x_nchw
            if s > 1:
                x = x[:, :, ::s, ::s]
            nb, _, ho, wo = x.shape
            x3 = x.reshape(nb, cin, ho * wo)               # free (contiguous) reshape
            if compute_dtype is not None:
                x3 = x3.astype(compute_dtype)
            wmat = self.weight[:, :, 0, 0] * scale[:, None]   # (Cout, Cin), BN folded (f32)
            if compute_dtype is not None:
                wmat = wmat.astype(compute_dtype)
            y = pointwise_conv_bn(x3, wmat, bias, out_dtype=out_dtype)
            return y.reshape(nb, self.out_channels, ho, wo)   # already NCHW

        # Spatial paths run NHWC internally (channels on the lane axis).
        # TODO(synk): keep activations NHWC across layers to drop these transposes.
        x = jnp.transpose(x_nchw, (0, 2, 3, 1))
        if compute_dtype is not None:
            x = x.astype(compute_dtype)

        if g == 1:
            wconv = jnp.transpose(self.weight, (2, 3, 1, 0)) * scale   # (K,K,Cin,Cout)
            if compute_dtype is not None:
                wconv = wconv.astype(compute_dtype)
            y = spatial_conv_bn(x, wconv, bias, ksize=k, stride=s, padding=p,
                                depthwise=False, out_dtype=out_dtype)
        elif g == cin and cin == self.out_channels and k > 1:
            wdw = jnp.transpose(self.weight[:, 0, :, :], (1, 2, 0)) * scale   # (K,K,C)
            if compute_dtype is not None:
                wdw = wdw.astype(compute_dtype)
            y = spatial_conv_bn(x, wdw, bias, ksize=k, stride=s, padding=p,
                                depthwise=True, out_dtype=out_dtype)
        else:
            # TODO(synk): grouped conv with 1 < groups < in_channels not implemented.
            raise NotImplementedError("unsupported ConvBn configuration")

        return jnp.transpose(y, (0, 3, 1, 2))              # NHWC -> NCHW


# ---------------------------------------------------------------------------
# Pure-JAX reference (independent of the Pallas path)
# ---------------------------------------------------------------------------
def conv_bn_ref(x_nchw, layer: ConvBn):
    y = lax.conv_general_dilated(
        x_nchw, layer.weight,
        window_strides=(layer.stride, layer.stride),
        padding=((layer.padding, layer.padding), (layer.padding, layer.padding)),
        dimension_numbers=("NCHW", "OIHW", "NCHW"),
        feature_group_count=layer.groups)
    scale = layer.gamma / jnp.sqrt(layer.running_var + layer.eps)
    shift = layer.beta - layer.running_mean * scale
    return y * scale[None, :, None, None] + shift[None, :, None, None]


# ---------------------------------------------------------------------------
# Demo / correctness check
# ---------------------------------------------------------------------------
if __name__ == "__main__":
    key = jax.random.PRNGKey(0)
    kx1, kx2, kl1, kl2, kl3 = jax.random.split(key, 5)

    x = jax.random.normal(kx1, (2, 4, 16, 16), jnp.float32)        # module-default config
    x_dw = jax.random.normal(kx2, (2, 32, 16, 16), jnp.float32)    # depthwise config

    layer_pw = ConvBn(4, 32, kernel_size=1, stride=1, padding=0, groups=1, key=kl1)
    layer_3x3 = ConvBn(4, 16, kernel_size=3, stride=1, padding=1, groups=1, key=kl2)
    layer_dw = ConvBn(32, 32, kernel_size=3, stride=1, padding=1, groups=32, key=kl3)

    tests = [
        ("1x1 pointwise (module defaults)", layer_pw, x, None, 1e-4),
        ("3x3 conv, padding=1, groups=1", layer_3x3, x, None, 1e-4),
        ("3x3 depthwise, padding=1", layer_dw, x_dw, None, 1e-4),
        ("1x1 pointwise, bf16 operands", layer_pw, x, jnp.bfloat16, 5e-2),
    ]

    for name, layer, xin, cdt, tol in tests:
        out = jax.block_until_ready(layer(xin, compute_dtype=cdt))
        ref = conv_bn_ref(xin, layer)
        assert out.shape == ref.shape, (name, out.shape, ref.shape)
        if not jnp.allclose(out, ref, atol=tol, rtol=tol):
            err = float(jnp.max(jnp.abs(out - ref)))
            raise AssertionError(f"{name}: Pallas output mismatch (max abs err {err})")

    print("KERNEL_OK")
</pallas_src>

<mosaic_0001>
module attributes {stable_mosaic.version = 11 : i64} {
  func.func @_pointwise_kernel(%arg0: i32, %arg1: i32, %arg2: i32, %arg3: memref<1x4x256xf32, #tpu.memory_space<vmem>>, %arg4: memref<32x4xf32, #tpu.memory_space<vmem>>, %arg5: memref<32x1xf32, #tpu.memory_space<vmem>>, %arg6: memref<1x32x256xf32, #tpu.memory_space<vmem>>) attributes {dimension_semantics = [#tpu.dimension_semantics<parallel>, #tpu.dimension_semantics<parallel>, #tpu.dimension_semantics<parallel>], iteration_bounds = array<i64: 2, 1, 1>, scalar_prefetch = 0 : i64, scratch_operands = 0 : i64, tpu.core_type = #tpu.core_type<tc>, window_params = [{transform_indices = @transform_0, window_bounds = array<i64: 1, 4, 256>}, {transform_indices = @transform_1, window_bounds = array<i64: 32, 4>}, {transform_indices = @transform_2, window_bounds = array<i64: 32, 1>}, {transform_indices = @transform_3, window_bounds = array<i64: 1, 32, 256>}]} {
    %c0 = arith.constant 0 : index
    %c0_0 = arith.constant 0 : index
    %0 = vector.load %arg4[%c0, %c0_0] : memref<32x4xf32, #tpu.memory_space<vmem>>, vector<32x4xf32>
    %c0_1 = arith.constant 0 : index
    %c0_2 = arith.constant 0 : index
    %c0_3 = arith.constant 0 : index
    %1 = vector.load %arg3[%c0_1, %c0_2, %c0_3] : memref<1x4x256xf32, #tpu.memory_space<vmem>>, vector<1x4x256xf32>
    %2 = vector.shape_cast %1 : vector<1x4x256xf32> to vector<4x256xf32>
    %cst = arith.constant dense<0.000000e+00> : vector<32x256xf32>
    %3 = tpu.matmul %0, %2, %cst {dimension_numbers = #tpu.dot_dimension_numbers<[1], [0], [0], [1], [0, 0, 1, 1], [], []>} : vector<32x4xf32>, vector<4x256xf32>, vector<32x256xf32> -> vector<32x256xf32>
    %c0_4 = arith.constant 0 : index
    %c0_5 = arith.constant 0 : index
    %4 = vector.load %arg5[%c0_4, %c0_5] : memref<32x1xf32, #tpu.memory_space<vmem>>, vector<32x1xf32>
    %5 = vector.broadcast %4 : vector<32x1xf32> to vector<32x256xf32>
    %6 = arith.addf %3, %5 : vector<32x256xf32>
    %c0_6 = arith.constant 0 : index
    %c0_7 = arith.constant 0 : index
    %c0_8 = arith.constant 0 : index
    %7 = vector.load %arg6[%c0_6, %c0_7, %c0_8] : memref<1x32x256xf32, #tpu.memory_space<vmem>>, vector<1x32x256xf32>
    %8 = vector.shape_cast %7 : vector<1x32x256xf32> to vector<32x256xf32>
    %9 = vector.shape_cast %6 : vector<32x256xf32> to vector<1x32x256xf32>
    tpu.vector_store %arg6[%c0_6, %c0_7, %c0_8], %9 {strides = array<i32>} : memref<1x32x256xf32, #tpu.memory_space<vmem>>, vector<1x32x256xf32>,
    return
  }
  func.func @transform_0(%arg0: i32, %arg1: i32, %arg2: i32) -> (i32, i32, i32) {
    %c0_i32 = arith.constant 0 : i32
    %c0_i32_0 = arith.constant 0 : i32
    return %arg0, %c0_i32, %arg1 : i32, i32, i32
  }
  func.func @transform_1(%arg0: i32, %arg1: i32, %arg2: i32) -> (i32, i32) {
    %c0_i32 = arith.constant 0 : i32
    %c0_i32_0 = arith.constant 0 : i32
    return %arg2, %c0_i32 : i32, i32
  }
  func.func @transform_2(%arg0: i32, %arg1: i32, %arg2: i32) -> (i32, i32) {
    %c0_i32 = arith.constant 0 : i32
    %c0_i32_0 = arith.constant 0 : i32
    return %arg2, %c0_i32 : i32, i32
  }
  func.func @transform_3(%arg0: i32, %arg1: i32, %arg2: i32) -> (i32, i32, i32) {
    %c0_i32 = arith.constant 0 : i32
    return %arg0, %arg2, %arg1 : i32, i32, i32
  }
}

</mosaic_0001>

<bundles_post_ra>
// kernel: tpu_custom_call.1
= control target key start
LH: loop header
LB: loop body
LE: loop exit
PB: predicated region body
PF: predicated region fallthrough
CT: control target
= control target key end

     0   :  { %8 = vsyncpa [#allocation3], 0  ;;  %s865_s0 = inlined_call_operand.vmem [shape: f32[2,4,256], index: 0, kind: input, shape index: {}]   ;;  %s866_s1 = inlined_call_operand.vmem [shape: f32[32,4], index: 1, kind: input, shape index: {}]   ;;  %s867_s2 = inlined_call_operand.vmem [shape: f32[32,1], index: 2, kind: input, shape index: {}]   ;;  %s868_s3 = inlined_call_operand.hbm [shape: f32[2,32,256], index: 3, kind: output, shape index: {}]  }
   0x1   :  { %10 = vsyncpa [#allocation3 + $0x1], 0  ;;  %s723_s12 = smov 0   ;;  %s725_s13 = smov 0  }
   0x2   :  { %s727_s14 = smov 0   ;;  %s729_s15 = smov 0  }
   0x3   :  { %s731_s16 = smov 0   ;;  %s733_s17 = smov 0  }
   0x4 LB: > { %s533_s18 = sadd.s32 4294967295, %s696_s17   ;;  %s534_s19 = sadd.s32 4294967294, %s696_s17   ;;  %s696_s17 = sphi %s733_s17, %s16_s17   ;;  %s692_s16 = sphi %s731_s16, %s875_s16   ;;  %s688_s15 = sphi %s729_s15, %s874_s15   ;;  %s684_s14 = sphi %s727_s14, %s873_s14   ;;  %s680_s13 = sphi %s725_s13, %s872_s13   ;;  %s676_s12 = sphi %s723_s12, %s871_s12  }
   0x5   : > { %s35_s20 = sadd.s32 1, %s692_s16  ;;  %s126_s21 = sadd.s32 1, %s684_s14 }
   0x6   : > { %p37_p0 = scmp.ge.s32.totalorder %s35_s20, 2  ;;  %p136_p1 = scmp.ne.s32.totalorder %s684_s14, %s680_s13 }
   0x7   : > { %p137_p2 = scmp.eq.s32.totalorder %s533_s18, 1  ;;  %p142_p3 = scmp.ne.s32.totalorder %s680_s13, %s676_s12 }
   0x8   : > { %s877_s20 = smov (%p37_p0, %s35_s20), 0  ;;  %p143_p5 = scmp.eq.s32.totalorder %s534_s19, 1 }
   0x9   : > { %p763_p4 = por %p137_p2, %p136_p1  ;;  %s119_s23 = ssub.s32 %s692_s16, %s877_s20 }
   0xa   : > { %p539_p6 = scmp.ge.s32.totalorder %s696_s17, 1  ;;  %p124_p7 = scmp.eq.s32.totalorder %s119_s23, 0 }
   0xb   : > { %p770_p8 = por %p143_p5, %p142_p3  ;;  %p192_p9 = scmp.lt.s32.totalorder %s696_s17, 3 }
   0xc   : > { %s776_s25 = scalar_select %p124_p7, %s684_s14, %s126_s21  }
   0xd   : > { %p193_p10 = pnand %p539_p6, %p192_p9 }
   0xe   : > { %p231_p11 = scmp.lt.s32.totalorder (!%p193_p10), %s688_s15, 1  ;;  %s227_s30 = sand.u32 (!%p193_p10), 1, %s680_s13  }
   0xf   : > { %196 = sbr.rel (%p193_p10) target bundleno = 245 (0xf5), region = 32  ;;  %s555_s6 = sshll.u32 (!%p193_p10), %s688_s15, 10 }
  0x10   : > { %s814_s10 = scalar_lea.hbm (!%p193_p10), %s868_s3, %s555_s6  ;;  %s700_s18 = smov (!%p193_p10), [#allocation2]  }
  0x11   : > { %s624_s19 = sshll.u32 (!%p193_p10), %s700_s18, 4  ;;  %s625_s19 = int_to_ptr.vmem [resolvable:$false] %s624_s19 }
  0x12   : > { %s626_s21 = scalar_lea.vmem (!%p193_p10), %s625_s19, 2048 }
  0x14   : > { %v698_v0 = vmov 0.0   ;;  %v261_v1 = vld [vmem:[%s867_s2 + $0x10] sm:$0xff]  ;;  %s232_s28 = scalar_select %p231_p11, %s688_s15, 1  ;;  %v699_v2 = vmov 0   ;;  %v259_v3 = vld [vmem:[%s867_s2] sm:$0xff]  ;;  %v262_v4 = vld [vmem:[%s867_s2 + $0x18] sm:$0xff] }
  0x15   : > { %367 = vmatprep.mubr.f32.mxu0 %v698_v0  ;;  %379 = vmatprep.mubr.f32.mxu1 %v698_v0  ;;  %v260_v5 = vld [vmem:[%s867_s2 + $0x8] sm:$0xff]  ;;  %vm298_vm0 = vcmask 1043456   ;;  %v254_v8 = vld [vmem:[%s866_s1] sm:$0xff]  ;;  %vm285_vm1 = vcmask 31744   ;;  %v256_v9 = vld [vmem:[%s866_s1 + $0x10] sm:$0xff]  ;;  %s820_s15 = scalar_lea.sflag [#allocation3], %s227_s30 }
  0x16   : > { %618 = vset.pattern.permute.xlu1 %v699_v2  ;;  %617 = vset.pattern.permute.xlu0 %v699_v2  ;;  %s554_s4 = sshll.u32 %s232_s28, 3  ;;  %v255_v10 = vld [vmem:[%s866_s1 + $0x8] sm:$0xff]  ;;  %v257_v11 = vld [vmem:[%s866_s1 + $0x18] sm:$0xff] }
  0x17   : > { %275 = vperm.xlu1 %618, %v261_v1   ;;  %265 = vperm.xlu0 %617, %v259_v3   ;;  %s238_s11 = scalar_lea.vmem %s865_s0, %s554_s4  ;;  %s540_s4 = sshll.u32 %s227_s30, 6 }
  0x18   : > { %v258_v6 = vld [vmem:[%s238_s11] sm:$0xff]  ;;  %s229_s5 = scalar_lea.vmem [#allocation2], %s540_s4 }
  0x19   : > { %v284_v7 = vcombine.high %v258_v6, %v258_v6  ;;  %s419_s7 = sshll.u32 %s229_s5, 4  ;;  %s816_s7 = int_to_ptr.vmem [resolvable:$true] %s419_s7 }
  0x1a   : > { %s620_s11 = scalar_lea.vmem %s816_s7, 1024  ;;  %p627_p1 = scmp.lt.s32.totalorder %s816_s7, %s625_s19 }
  0x1b   : > { %280 = vperm.xlu1 %618, %v262_v4   ;;  %270 = vperm.xlu0 %617, %v260_v5   ;;  %p621_p12 = scmp.ne.s32.totalorder %s816_s7, %s620_s11  ;;  %p628_p2 = scmp.lt.s32.totalorder %s626_s21, %s620_s11 }
  0x1c   : > { %543 = vmatprep.subr.msk.mxu0 %vm298_vm0, %v284_v7  ;;  %556 = vmatprep.subr.msk.mxu1 %vm298_vm0, %v284_v7 }
  0x1d   : > { %544 = vmatpush1.msk.msra.mxu0 %vm298_vm0, %v258_v6  ;;  %557 = vmatpush1.msk.msra.mxu1 %vm298_vm0, %v258_v6  ;;  %p622_p13 = pnand %p621_p12, %p763_p4  ;;  %p629_p3 = por %p628_p2, %p627_p1 }
  0x1e   : > { %545 = vmatmul.mubr.msk.f32.vlgmr.msra.gmra.mxu0 %vm285_vm1, %v254_v8  ;;  %547 = vmatmul.mubr.msk.f32.vlgmr.msra.gmra.mxu1 %vm285_vm1, %v256_v9 }
  0x1f   : > { %373 = vmatprep.mubr.f32.mxu0 %v698_v0  ;;  %385 = vmatprep.mubr.f32.mxu1 %v698_v0  ;;  %p623_p0 = pneg %p622_p13 }
  0x21   : > { %p630_p5 = pnand %p629_p3, %p623_p0 }
  0x22   : > { %546 = vmatmul.mubr.msk.f32.gmra.mxu0 %vm285_vm1, %v255_v10  ;;  %548 = vmatmul.mubr.msk.f32.gmra.mxu1 %vm285_vm1, %v257_v11 }
  0x92   : > { %v276_v12 = vpop.permute.xlu1 %275  ;;  %v266_v13 = vpop.permute.xlu0 %265 }
  0x96   : > { %v281_v20 = vpop.permute.xlu1 %280  ;;  %v271_v21 = vpop.permute.xlu0 %270 }
  0xde   : > { %v369_v14 = vpop.f32.mrf.mxu0  ;;  %v381_v15 = vpop.f32.mrf.mxu1 }
  0xdf   : > { %v370_v16 = vadd.f32 %v369_v14, %v266_v13  ;;  %v382_v17 = vadd.f32 %v381_v15, %v276_v12 }
  0xe0   : > { %v371_v18 = vpop.f32.mrf.mxu0  ;;  %v383_v19 = vpop.f32.mrf.mxu1 }
  0xe1   : > { %392 = vst [vmem:[%s229_s5] sm:$0xff] %v370_v16  ;;  %396 = vst [vmem:[%s229_s5 + $0x20] sm:$0xff] %v382_v17  ;;  %v372_v22 = vadd.f32 %v371_v18, %v266_v13  ;;  %v384_v23 = vadd.f32 %v383_v19, %v276_v12 }
  0xe2   : > { %v375_v24 = vpop.f32.mrf.mxu0  ;;  %v387_v25 = vpop.f32.mrf.mxu1 }
  0xe3   : > { %393 = vst [vmem:[%s229_s5 + $0x8] sm:$0xff] %v372_v22  ;;  %397 = vst [vmem:[%s229_s5 + $0x28] sm:$0xff] %v384_v23  ;;  %v376_v26 = vadd.f32 %v375_v24, %v271_v21  ;;  %v388_v27 = vadd.f32 %v387_v25, %v281_v20 }
  0xe4   : > { %v377_v28 = vpop.f32.mrf.mxu0  ;;  %v389_v29 = vpop.f32.mrf.mxu1 }
  0xe5   : > { %394 = vst [vmem:[%s229_s5 + $0x10] sm:$0xff] %v376_v26  ;;  %398 = vst [vmem:[%s229_s5 + $0x30] sm:$0xff] %v388_v27  ;;  %v378_v30 = vadd.f32 %v377_v28, %v271_v21  ;;  %v390_v31 = vadd.f32 %v389_v29, %v281_v20 }
  0xe7   : > { %395 = vst [vmem:[%s229_s5 + $0x18] sm:$0xff] %v378_v30  ;;  %399 = vst [vmem:[%s229_s5 + $0x38] sm:$0xff] %v390_v31 }
  0xe8   : > { %633 = shalt.err (!%p630_p5)
}
  0xe9   : > { %s634_s23 = scalar_lea.hbm %s814_s10, 1024  ;;  %s638_s28 = scalar_lea.hbm %s868_s3, 2048 }
  0xea   : > { %p635_p6 = scmp.ne.s32.totalorder %s814_s10, %s634_s23  ;;  %p639_p10 = scmp.lt.s32.totalorder %s814_s10, %s868_s3 }
  0xeb   : > { %p640_p11 = scmp.lt.s32.totalorder %s638_s28, %s634_s23 }
  0xec   : > { %p636_p7 = pnand %p635_p6, %p763_p4 }
  0xed   : > { %p641_p12 = por %p640_p11, %p639_p10 }
  0xee   : > { %p637_p9 = pneg %p636_p7 }
  0xf0   : > { %p642_p13 = pnand %p641_p12, %p637_p9 }
  0xf2   : > { %645 = shalt.err (!%p642_p13)
}
  0xf3   : > { %s701_s4 = smov 256   ;;  %s702_s5 = smov 16  }
  0xf4   : > { %558 = dma.vmem_to_hbm [thread:$0]  (%p763_p4), %s816_s7, 1024, %s814_s10, %s820_s15, %s701_s4, %s701_s4, %s702_s5  }
  0xf5 PF: > { %p564_p0 = scmp.ge.s32.totalorder %s696_s17, 2  ;;  %s434_s6 = sand.u32 1, %s676_s12  }
  0xf6   : > { %s435_s8 = scalar_lea.sflag [#allocation3], %s434_s6 }
  0xf7   : > { %p561_p1 = pnand %p564_p0, %p770_p8 }
  0xf9   : > { %p562_p2 = pneg %p561_p1 }
  0xfb   : > { %671 = dma.done.wait (%p562_p2), %s435_s8, 1024  }
  0xfc   : > { %673 = vsyncadd (%p562_p2), %s435_s8, 4294966272  ;;  %s16_s17 = sadd.s32 1, %s696_s17   ;;  %s871_s12 = smov %s680_s13 }
  0xfd   : > { %p13_p3 = scmp.ge.s32.totalorder %s16_s17, 4   ;;  %s872_s13 = smov %s684_s14 }
  0xfe   : > { %s873_s14 = smov %s776_s25  ;;  %s874_s15 = smov %s692_s16 }
  0xff   : > { %s875_s16 = smov %s877_s20  ;;  %15 = sbr.rel (!%p13_p3) target bundleno = 4 (0x4), region = 73 }
 0x104   :  { %440 = vsyncpa [#allocation3], 1 }
 0x105   :  { %442 = vsyncpa [#allocation3 + $0x1], 1 }

</bundles_post_ra>
